<compile_context>
chip_gen: v6e
topology: v6e:2x2x1
jax: 0.10.0
libtpu: 0.0.40
codegen_flags: <defaults>
</compile_context>

<pallas_src>
import jax
import jax.numpy as jnp
from jax import lax
from jax.experimental import pallas as pl
from jax.experimental.pallas import tpu as pltpu

LN_EPS = 1e-5  # PyTorch nn.LayerNorm default


def _layernorm_kernel(x_ref, w_ref, b_ref, o_ref):
    # x_ref: (tile_n, F, tile_t)   F on sublanes, T on lanes
    # w_ref/b_ref: (F, 1)          broadcast across lanes (and batch)
    x = x_ref[...].astype(jnp.float32)
    f = x.shape[1]
    inv_f = jnp.float32(1.0 / f)

    # Single-pass statistics over the feature (sublane) axis -> XLU reduction.
    s1 = jnp.sum(x, axis=1, keepdims=True)            # (tile_n, 1, tile_t)
    s2 = jnp.sum(x * x, axis=1, keepdims=True)        # (tile_n, 1, tile_t)
    mean = s1 * inv_f
    var = jnp.maximum(s2 * inv_f - mean * mean, 0.0)  # biased, like nn.LayerNorm
    inv = lax.rsqrt(var + LN_EPS)

    # Hoisted affine params, broadcast once per tile.
    w = w_ref[...].astype(jnp.float32)[None, :, :]    # (1, F, 1)
    b = b_ref[...].astype(jnp.float32)[None, :, :]    # (1, F, 1)

    y = (x - mean) * inv * w + b
    o_ref[...] = y.astype(o_ref.dtype)


def _largest_divisor_leq(n, cap):
    cap = max(1, min(n, cap))
    for d in range(cap, 0, -1):
        if n % d == 0:
            return d
    return 1


def _pick_tile_t(t):
    """Lane-axis tile: multiple of 128 dividing T when possible, else full T."""
    if t % 128 != 0:
        return t  # full extent is always a legal block dim
    best = 128
    cand = 128
    while cand <= min(t, 2048):
        if t % cand == 0:
            best = cand
        cand += 128
    return best


def _pick_tile_n(n, feats, tile_t, itemsize, budget_bytes=4 * 1024 * 1024):
    """Batch-axis tile sized so each buffer stays ~<= 4 MiB.

    With double-buffered input + output that is <= ~16 MiB of VMEM, which
    fits the 32 MiB scoped default on v5e/v6e and the tighter v7x budget.
    """
    per_row = feats * tile_t * itemsize
    cap = max(1, budget_bytes // per_row)
    return _largest_divisor_leq(n, cap)


def cnn_layer_norm(x, weight, bias):
    """Forward of CNNLayerNorm. x: (B, C, n_feats, time)."""
    B, C, F, T = x.shape
    N = B * C
    # Merge leading dims only -- no transpose, no data movement.
    x3 = x.reshape(N, F, T)
    w2d = weight.reshape(F, 1)
    b2d = bias.reshape(F, 1)

    tile_t = _pick_tile_t(T)
    tile_n = _pick_tile_n(N, F, tile_t, x.dtype.itemsize)
    grid = (N // tile_n, T // tile_t)

    y3 = pl.pallas_call(
        _layernorm_kernel,
        out_shape=jax.ShapeDtypeStruct((N, F, T), x.dtype),
        grid_spec=pltpu.PrefetchScalarGridSpec(
            num_scalar_prefetch=0,
            grid=grid,
            in_specs=[
                pl.BlockSpec((tile_n, F, tile_t), lambda i, j: (i, 0, j)),
                pl.BlockSpec((F, 1), lambda i, j: (0, 0)),
                pl.BlockSpec((F, 1), lambda i, j: (0, 0)),
            ],
            out_specs=pl.BlockSpec((tile_n, F, tile_t), lambda i, j: (i, 0, j)),
        ),
        compiler_params=pltpu.CompilerParams(
            dimension_semantics=("parallel", "parallel"),
        ),
    )(x3, w2d, b2d)

    return y3.reshape(B, C, F, T)


def _reference(x, weight, bias):
    # LayerNorm over n_feats (axis=2) of the original NCHW layout, matching
    # transpose(2,3) -> LayerNorm(n_feats) -> transpose(2,3).
    mean = jnp.mean(x, axis=2, keepdims=True)
    var = jnp.mean((x - mean) ** 2, axis=2, keepdims=True)
    w = weight.reshape(1, 1, -1, 1)
    b = bias.reshape(1, 1, -1, 1)
    return (x - mean) * lax.rsqrt(var + LN_EPS) * w + b


if __name__ == "__main__":
    key = jax.random.PRNGKey(0)
    k_x, k_w, k_b = jax.random.split(key, 3)

    B, C, n_feats, T = 2, 4, 16, 16
    x = jax.random.normal(k_x, (B, C, n_feats, T), dtype=jnp.float32)
    # nn.LayerNorm(n_feats) params (random so the affine path is exercised).
    weight = 1.0 + 0.1 * jax.random.normal(k_w, (n_feats,), dtype=jnp.float32)
    bias = 0.1 * jax.random.normal(k_b, (n_feats,), dtype=jnp.float32)

    out = cnn_layer_norm(x, weight, bias)
    out = jax.block_until_ready(out)

    ref = _reference(x, weight, bias)
    assert out.shape == x.shape
    assert jnp.allclose(out, ref, atol=1e-4, rtol=1e-4), "mismatch vs reference"

    print("KERNEL_OK")
</pallas_src>

<mosaic_0001>
module attributes {stable_mosaic.version = 11 : i64} {
  func.func @_layernorm_kernel(%arg0: i32, %arg1: i32, %arg2: memref<8x16x16xf32, #tpu.memory_space<vmem>>, %arg3: memref<16x1xf32, #tpu.memory_space<vmem>>, %arg4: memref<16x1xf32, #tpu.memory_space<vmem>>, %arg5: memref<8x16x16xf32, #tpu.memory_space<vmem>>) attributes {dimension_semantics = [#tpu.dimension_semantics<parallel>, #tpu.dimension_semantics<parallel>], iteration_bounds = array<i64: 1, 1>, scalar_prefetch = 0 : i64, scratch_operands = 0 : i64, tpu.core_type = #tpu.core_type<tc>, window_params = [{transform_indices = @transform_0, window_bounds = array<i64: 8, 16, 16>}, {pipeline_mode = #tpu.pipeline_mode<synchronous>, transform_indices = @transform_1, window_bounds = array<i64: 16, 1>}, {pipeline_mode = #tpu.pipeline_mode<synchronous>, transform_indices = @transform_2, window_bounds = array<i64: 16, 1>}, {transform_indices = @transform_3, window_bounds = array<i64: 8, 16, 16>}]} {
    %c0 = arith.constant 0 : index
    %c0_0 = arith.constant 0 : index
    %c0_1 = arith.constant 0 : index
    %0 = vector.load %arg2[%c0, %c0_0, %c0_1] : memref<8x16x16xf32, #tpu.memory_space<vmem>>, vector<8x16x16xf32>
    %cst = arith.constant dense<0.000000e+00> : vector<8x16xf32>
    %1 = vector.multi_reduction <add>, %0, %cst [1] : vector<8x16x16xf32> to vector<8x16xf32>
    %2 = vector.shape_cast %1 : vector<8x16xf32> to vector<8x1x16xf32>
    %3 = arith.mulf %0, %0 : vector<8x16x16xf32>
    %cst_2 = arith.constant dense<0.000000e+00> : vector<8x16xf32>
    %4 = vector.multi_reduction <add>, %3, %cst_2 [1] : vector<8x16x16xf32> to vector<8x16xf32>
    %5 = vector.shape_cast %4 : vector<8x16xf32> to vector<8x1x16xf32>
    %cst_3 = arith.constant 6.250000e-02 : f32
    %6 = vector.broadcast %cst_3 : f32 to vector<8x1x16xf32>
    %7 = arith.mulf %2, %6 : vector<8x1x16xf32>
    %cst_4 = arith.constant 6.250000e-02 : f32
    %8 = vector.broadcast %cst_4 : f32 to vector<8x1x16xf32>
    %9 = arith.mulf %5, %8 : vector<8x1x16xf32>
    %10 = arith.mulf %7, %7 : vector<8x1x16xf32>
    %11 = arith.subf %9, %10 : vector<8x1x16xf32>
    %cst_5 = arith.constant 0.000000e+00 : f32
    %12 = vector.broadcast %cst_5 : f32 to vector<8x1x16xf32>
    %13 = arith.maximumf %11, %12 : vector<8x1x16xf32>
    %cst_6 = arith.constant 9.99999974E-6 : f32
    %14 = vector.broadcast %cst_6 : f32 to vector<8x1x16xf32>
    %15 = arith.addf %13, %14 : vector<8x1x16xf32>
    %16 = math.rsqrt %15 : vector<8x1x16xf32>
    %c0_7 = arith.constant 0 : index
    %c0_8 = arith.constant 0 : index
    %17 = vector.load %arg3[%c0_7, %c0_8] : memref<16x1xf32, #tpu.memory_space<vmem>>, vector<16x1xf32>
    %18 = vector.shape_cast %17 : vector<16x1xf32> to vector<1x16x1xf32>
    %c0_9 = arith.constant 0 : index
    %c0_10 = arith.constant 0 : index
    %19 = vector.load %arg4[%c0_9, %c0_10] : memref<16x1xf32, #tpu.memory_space<vmem>>, vector<16x1xf32>
    %20 = vector.shape_cast %19 : vector<16x1xf32> to vector<1x16x1xf32>
    %21 = vector.broadcast %7 : vector<8x1x16xf32> to vector<8x16x16xf32>
    %22 = arith.subf %0, %21 : vector<8x16x16xf32>
    %23 = vector.broadcast %16 : vector<8x1x16xf32> to vector<8x16x16xf32>
    %24 = arith.mulf %22, %23 : vector<8x16x16xf32>
    %25 = vector.broadcast %18 : vector<1x16x1xf32> to vector<8x16x16xf32>
    %26 = arith.mulf %24, %25 : vector<8x16x16xf32>
    %27 = vector.broadcast %20 : vector<1x16x1xf32> to vector<8x16x16xf32>
    %28 = arith.addf %26, %27 : vector<8x16x16xf32>
    %c0_11 = arith.constant 0 : index
    %c0_12 = arith.constant 0 : index
    %c0_13 = arith.constant 0 : index
    %29 = vector.load %arg5[%c0_11, %c0_12, %c0_13] : memref<8x16x16xf32, #tpu.memory_space<vmem>>, vector<8x16x16xf32>
    tpu.vector_store %arg5[%c0_11, %c0_12, %c0_13], %28 {strides = array<i32>} : memref<8x16x16xf32, #tpu.memory_space<vmem>>, vector<8x16x16xf32>,
    return
  }
  func.func @transform_0(%arg0: i32, %arg1: i32) -> (i32, i32, i32) {
    %c0_i32 = arith.constant 0 : i32
    %c0_i32_0 = arith.constant 0 : i32
    return %arg0, %c0_i32, %arg1 : i32, i32, i32
  }
  func.func @transform_1(%arg0: i32, %arg1: i32) -> (i32, i32) {
    %c0_i32 = arith.constant 0 : i32
    %c0_i32_0 = arith.constant 0 : i32
    %c0_i32_1 = arith.constant 0 : i32
    return %c0_i32, %c0_i32_0 : i32, i32
  }
  func.func @transform_2(%arg0: i32, %arg1: i32) -> (i32, i32) {
    %c0_i32 = arith.constant 0 : i32
    %c0_i32_0 = arith.constant 0 : i32
    %c0_i32_1 = arith.constant 0 : i32
    return %c0_i32, %c0_i32_0 : i32, i32
  }
  func.func @transform_3(%arg0: i32, %arg1: i32) -> (i32, i32, i32) {
    %c0_i32 = arith.constant 0 : i32
    %c0_i32_0 = arith.constant 0 : i32
    return %arg0, %c0_i32, %arg1 : i32, i32, i32
  }
}

</mosaic_0001>

<bundles_post_ra>
// kernel: tpu_custom_call.1
= control target key start
LH: loop header
LB: loop body
LE: loop exit
PB: predicated region body
PF: predicated region fallthrough
CT: control target
= control target key end

     0   :  { %8 = vsyncpa [#allocation3], 0  ;;  %s707_s0 = inlined_call_operand.hbm [shape: f32[8,16,16], index: 0, kind: input, shape index: {}]   ;;  %s708_s1 = inlined_call_operand.vmem [shape: f32[16,1], index: 1, kind: input, shape index: {}]   ;;  %s709_s2 = inlined_call_operand.vmem [shape: f32[16,1], index: 2, kind: input, shape index: {}]   ;;  %s710_s3 = inlined_call_operand.hbm [shape: f32[8,16,16], index: 3, kind: output, shape index: {}]  }
   0x1   :  { %9 = vsyncpa [#allocation4], 0  ;;  %s450_s12 = smov [#allocation2]  }
   0x2   :  { %s15_s13 = sshll.u32 %s450_s12, 4  ;;  %s16_s13 = int_to_ptr.vmem [resolvable:$true] %s15_s13 }
   0x3   :  { %s414_s14 = scalar_lea.vmem %s16_s13, 2048  ;;  %p419_p1 = scmp.lt.s32.totalorder %s16_s13, %s16_s13 }
   0x4   :  { %p415_p0 = scmp.ne.s32.totalorder %s16_s13, %s414_s14  ;;  %p420_p2 = scmp.lt.s32.totalorder %s414_s14, %s414_s14 }
   0x6   :  { %p421_p3 = por %p420_p2, %p419_p1 }
   0x8   :  { %p422_p4 = pnand %p421_p3, %p415_p0 }
   0xa   :  { %425 = shalt.err (!%p422_p4)
}
   0xb   :  { %s451_s15 = smov 128   ;;  %s452_s16 = smov 8  }
   0xc   :  { %21 = dma.hbm_to_vmem [thread:$0]  %s707_s0, 2048, %s16_s13, [#allocation3], %s451_s15, %s451_s15, %s452_s16  }
   0xd   :  { %446 = dma.done.wait [#allocation3], 2048  }
   0xe   :  { %447 = vsyncadd [#allocation3], 4294965248  ;;  %v453_v0 = vmov 0   ;;  %v264_v1 = vld [vmem:[%s709_s2] sm:$0xff]  ;;  %v265_v3 = vld [vmem:[%s709_s2 + $0x8] sm:$0xff]  ;;  %vm45_vm0 = vcmask 130048  }
   0xf   :  { %389 = vset.pattern.permute.xlu1 %v453_v0  ;;  %388 = vset.pattern.permute.xlu0 %v453_v0  ;;  %v262_v2 = vld [vmem:[%s708_s1] sm:$0xff]  ;;  %v263_v4 = vld [vmem:[%s708_s1 + $0x8] sm:$0xff]  ;;  %v497_v7 = vld [vmem:[#allocation2 + $0x10] sm:$0xff]  ;;  %s454_s1 = smov [#allocation5]  }
  0x10   :  { %326 = vperm.xlu1 %389, %v264_v1   ;;  %300 = vperm.xlu0 %388, %v262_v2   ;;  %v493_v5 = vld [vmem:[#allocation2] sm:$0xff]  ;;  %v495_v6 = vld [vmem:[#allocation2 + $0x8] sm:$0xff]  ;;  %v499_v8 = vld [vmem:[#allocation2 + $0x18] sm:$0xff]  ;;  %v55_v16 = vsel %vm45_vm0, %v497_v7, 0.0  ;;  %v120_v47 = vmul.f32 %v497_v7, %v497_v7  ;;  %s371_s2 = sshll.u32 %s454_s1, 4  ;;  %s372_s2 = int_to_ptr.vmem [resolvable:$true] %s371_s2 }
  0x11   :  { %v501_v9 = vld [vmem:[#allocation2 + $0x20] sm:$0xff]  ;;  %v46_v10 = vsel %vm45_vm0, %v493_v5, 0.0  ;;  %v47_v11 = vsel %vm45_vm0, %v495_v6, 0.0  ;;  %v507_v12 = vld [vmem:[#allocation2 + $0x28] sm:$0xff]  ;;  %v509_v13 = vld [vmem:[#allocation2 + $0x30] sm:$0xff]  ;;  %v56_v17 = vsel %vm45_vm0, %v499_v8, 0.0  ;;  %v118_v38 = vmul.f32 %v493_v5, %v493_v5  ;;  %p431_p6 = scmp.lt.s32.totalorder %s372_s2, %s372_s2 }
  0x12   :  { %v511_v14 = vld [vmem:[#allocation2 + $0x38] sm:$0xff]  ;;  %v48_v15 = vadd.f32 %v47_v11, %v46_v10  ;;  %v64_v18 = vsel %vm45_vm0, %v501_v9, 0.0  ;;  %v65_v19 = vsel %vm45_vm0, %v507_v12, 0.0  ;;  %v73_v20 = vsel %vm45_vm0, %v509_v13, 0.0  ;;  %v525_v22 = vld [vmem:[#allocation2 + $0x40] sm:$0xff]  ;;  %v527_v23 = vld [vmem:[#allocation2 + $0x48] sm:$0xff] }
  0x13   :  { %v74_v21 = vsel %vm45_vm0, %v511_v14, 0.0  ;;  %v529_v24 = vld [vmem:[#allocation2 + $0x50] sm:$0xff]  ;;  %v531_v25 = vld [vmem:[#allocation2 + $0x58] sm:$0xff]  ;;  %v533_v26 = vadd.f32 %v56_v17, %v55_v16  ;;  %v535_v28 = vadd.f32 %v65_v19, %v64_v18  ;;  %v82_v30 = vsel %vm45_vm0, %v525_v22, 0.0  ;;  %v543_v32 = vld [vmem:[#allocation2 + $0x60] sm:$0xff]  ;;  %s426_s26 = scalar_lea.vmem %s372_s2, 2048 }
  0x14   :  { %331 = vperm.xlu1 %389, %v265_v3   ;;  %305 = vperm.xlu0 %388, %v263_v4   ;;  %v49_v27 = vrot.slane %v48_v15, 4  ;;  %v537_v29 = vadd.f32 %v74_v21, %v73_v20  ;;  %v83_v31 = vsel %vm45_vm0, %v527_v23, 0.0  ;;  %v91_v33 = vsel %vm45_vm0, %v529_v24, 0.0  ;;  %v549_v35 = vld [vmem:[#allocation2 + $0x68] sm:$0xff]  ;;  %v551_v36 = vld [vmem:[#allocation2 + $0x70] sm:$0xff]  ;;  %v558_v40 = vld [vmem:[#allocation2 + $0x78] sm:$0xff]  ;;  %p427_p5 = scmp.ne.s32.totalorder %s372_s2, %s426_s26  ;;  %p432_p7 = scmp.lt.s32.totalorder %s426_s26, %s426_s26 }
  0x15   :  { %v92_v34 = vsel %vm45_vm0, %v531_v25, 0.0  ;;  %v58_v37 = vrot.slane %v533_v26, 4  ;;  %v119_v39 = vmul.f32 %v495_v6, %v495_v6  ;;  %v67_v42 = vrot.slane %v535_v28, 4 }
  0x16   :  { %v560_v41 = vadd.f32 %v49_v27, %v48_v15  ;;  %v76_v43 = vrot.slane %v537_v29, 4  ;;  %v84_v44 = vadd.f32 %v83_v31, %v82_v30  ;;  %v93_v45 = vadd.f32 %v92_v34, %v91_v33  ;;  %p433_p8 = por %p432_p7, %p431_p6 }
  0x17   :  { %v100_v46 = vsel %vm45_vm0, %v543_v32, 0.0  ;;  %v121_v48 = vmul.f32 %v499_v8, %v499_v8  ;;  %v101_v49 = vsel %vm45_vm0, %v549_v35, 0.0  ;;  %v109_v50 = vsel %vm45_vm0, %v551_v36, 0.0 }
  0x18   :  { %v122_v51 = vmul.f32 %v501_v9, %v501_v9  ;;  %v123_v52 = vmul.f32 %v507_v12, %v507_v12  ;;  %v110_v53 = vsel %vm45_vm0, %v558_v40, 0.0  ;;  %v124_v54 = vmul.f32 %v509_v13, %v509_v13  ;;  %p434_p9 = pnand %p433_p8, %p427_p5 }
  0x19   :  { %v125_v55 = vmul.f32 %v511_v14, %v511_v14  ;;  %v126_v56 = vmul.f32 %v525_v22, %v525_v22  ;;  %v127_v57 = vmul.f32 %v527_v23, %v527_v23  ;;  %v128_v58 = vmul.f32 %v529_v24, %v529_v24 }
  0x1a   :  { %v134_v59 = vsel %vm45_vm0, %v118_v38, 0.0  ;;  %v135_v60 = vsel %vm45_vm0, %v119_v39, 0.0  ;;  %v129_v61 = vmul.f32 %v531_v25, %v531_v25  ;;  %v130_v62 = vmul.f32 %v543_v32, %v543_v32 }
  0x1b   :  { %v143_v63 = vsel %vm45_vm0, %v120_v47, 0.0  ;;  %v144_v0 = vsel %vm45_vm0, %v121_v48, 0.0  ;;  %v131_v1 = vmul.f32 %v549_v35, %v549_v35  ;;  %v132_v2 = vmul.f32 %v551_v36, %v551_v36 }
  0x1c   :  { %v152_v3 = vsel %vm45_vm0, %v122_v51, 0.0  ;;  %v153_v4 = vsel %vm45_vm0, %v123_v52, 0.0  ;;  %v133_v10 = vmul.f32 %v558_v40, %v558_v40  ;;  %v136_v11 = vadd.f32 %v135_v60, %v134_v59 }
  0x1d   :  { %v161_v15 = vsel %vm45_vm0, %v124_v54, 0.0  ;;  %v162_v16 = vsel %vm45_vm0, %v125_v55, 0.0  ;;  %v85_v17 = vrot.slane %v84_v44, 4  ;;  %v145_v18 = vadd.f32 %v144_v0, %v143_v63 }
  0x1e   :  { %v170_v19 = vsel %vm45_vm0, %v126_v56, 0.0  ;;  %v171_v20 = vsel %vm45_vm0, %v127_v57, 0.0  ;;  %v102_v21 = vadd.f32 %v101_v49, %v100_v46  ;;  %v154_v27 = vadd.f32 %v153_v4, %v152_v3 }
  0x1f   :  { %v179_v30 = vsel %vm45_vm0, %v128_v58, 0.0  ;;  %v180_v31 = vsel %vm45_vm0, %v129_v61, 0.0  ;;  %v111_v33 = vadd.f32 %v110_v53, %v109_v50  ;;  %v163_v34 = vadd.f32 %v162_v16, %v161_v15 }
  0x20   :  { %v188_v38 = vsel %vm45_vm0, %v130_v62, 0.0  ;;  %v189_v39 = vsel %vm45_vm0, %v131_v1, 0.0  ;;  %v137_v47 = vrot.slane %v136_v11, 4  ;;  %v172_v48 = vadd.f32 %v171_v20, %v170_v19 }
  0x21   :  { %v197_v51 = vsel %vm45_vm0, %v132_v2, 0.0  ;;  %v198_v52 = vsel %vm45_vm0, %v133_v10, 0.0  ;;  %v59_v54 = vadd.f32 %v58_v37, %v533_v26  ;;  %v94_v46 = vrot.slane %v93_v45, 4 }
  0x22   :  { %v146_v49 = vrot.slane %v145_v18, 4  ;;  %v181_v55 = vadd.f32 %v180_v31, %v179_v30  ;;  %v68_v56 = vadd.f32 %v67_v42, %v535_v28  ;;  %v103_v57 = vrot.slane %v102_v21, 4 }
  0x23   :  { %v155_v50 = vrot.slane %v154_v27, 4  ;;  %v190_v53 = vadd.f32 %v189_v39, %v188_v38  ;;  %v77_v58 = vadd.f32 %v76_v43, %v537_v29  ;;  %v112_v59 = vrot.slane %v111_v33, 4 }
  0x24   :  { %v164_v60 = vrot.slane %v163_v34, 4  ;;  %v199_v61 = vadd.f32 %v198_v52, %v197_v51  ;;  %v51_v62 = vrot.slane %v560_v41, 2  ;;  %v86_v63 = vadd.f32 %v85_v17, %v84_v44 }
  0x25   :  { %v138_v0 = vadd.f32 %v137_v47, %v136_v11  ;;  %v173_v1 = vrot.slane %v172_v48, 4  ;;  %v60_v2 = vrot.slane %v59_v54, 2  ;;  %v95_v26 = vadd.f32 %v94_v46, %v93_v45 }
  0x26   :  { %v147_v37 = vadd.f32 %v146_v49, %v145_v18  ;;  %v182_v3 = vrot.slane %v181_v55, 4  ;;  %v69_v4 = vrot.slane %v68_v56, 2  ;;  %v104_v10 = vadd.f32 %v103_v57, %v102_v21 }
  0x27   :  { %v156_v28 = vadd.f32 %v155_v50, %v154_v27  ;;  %v191_v42 = vrot.slane %v190_v53, 4  ;;  %v78_v15 = vrot.slane %v77_v58, 2  ;;  %v113_v16 = vadd.f32 %v112_v59, %v111_v33 }
  0x28   :  { %v165_v19 = vadd.f32 %v164_v60, %v163_v34  ;;  %v200_v29 = vrot.slane %v199_v61, 4  ;;  %v52_v43 = vadd.f32 %v51_v62, %v560_v41  ;;  %v87_v20 = vrot.slane %v86_v63, 2 }
  0x29   :  { %v139_v30 = vrot.slane %v138_v0, 2  ;;  %v174_v31 = vadd.f32 %v173_v1, %v172_v48  ;;  %v61_v44 = vadd.f32 %v60_v2, %v59_v54  ;;  %v96_v11 = vrot.slane %v95_v26, 2 }
  0x2a   :  { %v148_v17 = vrot.slane %v147_v37, 2  ;;  %v183_v38 = vadd.f32 %v182_v3, %v181_v55  ;;  %v70_v45 = vadd.f32 %v69_v4, %v68_v56  ;;  %v105_v18 = vrot.slane %v104_v10, 2 }
  0x2b   :  { %v157_v39 = vrot.slane %v156_v28, 2  ;;  %v192_v47 = vadd.f32 %v191_v42, %v190_v53  ;;  %v79_v21 = vadd.f32 %v78_v15, %v77_v58  ;;  %v114_v27 = vrot.slane %v113_v16, 2 }
  0x2c   :  { %v166_v51 = vrot.slane %v165_v19, 2  ;;  %v201_v52 = vadd.f32 %v200_v29, %v199_v61  ;;  %v53_v33 = vrot.slane %v52_v43, 1  ;;  %v88_v34 = vadd.f32 %v87_v20, %v86_v63 }
  0x2d   :  { %v140_v46 = vadd.f32 %v139_v30, %v138_v0  ;;  %v175_v49 = vrot.slane %v174_v31, 2  ;;  %v62_v41 = vrot.slane %v61_v44, 1  ;;  %v97_v57 = vadd.f32 %v96_v11, %v95_v26 }
  0x2e   :  { %v149_v50 = vadd.f32 %v148_v17, %v147_v37  ;;  %v184_v48 = vrot.slane %v183_v38, 2  ;;  %v71_v54 = vrot.slane %v70_v45, 1  ;;  %v106_v59 = vadd.f32 %v105_v18, %v104_v10 }
  0x2f   :  { %v158_v60 = vadd.f32 %v157_v39, %v156_v28  ;;  %v193_v55 = vrot.slane %v192_v47, 2  ;;  %v80_v56 = vrot.slane %v79_v21, 1  ;;  %v115_v62 = vadd.f32 %v114_v27, %v113_v16 }
  0x30   :  { %v167_v1 = vadd.f32 %v166_v51, %v165_v19  ;;  %v202_v53 = vrot.slane %v201_v52, 2  ;;  %v54_v58 = vadd.f32 %v53_v33, %v52_v43  ;;  %v89_v2 = vrot.slane %v88_v34, 1 }
  0x31   :  { %v141_v3 = vrot.slane %v140_v46, 1  ;;  %v176_v61 = vadd.f32 %v175_v49, %v174_v31  ;;  %v63_v4 = vadd.f32 %v62_v41, %v61_v44  ;;  %v98_v63 = vrot.slane %v97_v57, 1 }
  0x32   :  { %v150_v0 = vrot.slane %v149_v50, 1  ;;  %v185_v42 = vadd.f32 %v184_v48, %v183_v38  ;;  %v72_v15 = vadd.f32 %v71_v54, %v70_v45  ;;  %v107_v26 = vrot.slane %v106_v59, 1 }
  0x33   :  { %v159_v37 = vrot.slane %v158_v60, 1  ;;  %v194_v29 = vadd.f32 %v193_v55, %v192_v47  ;;  %v81_v20 = vadd.f32 %v80_v56, %v79_v21  ;;  %v116_v10 = vrot.slane %v115_v62, 1 }
  0x34   :  { %v168_v28 = vrot.slane %v167_v1, 1  ;;  %v203_v30 = vadd.f32 %v202_v53, %v201_v52  ;;  %v90_v11 = vadd.f32 %v89_v2, %v88_v34  ;;  %v142_v16 = vadd.f32 %v141_v3, %v140_v46 }
  0x35   :  { %v177_v19 = vrot.slane %v176_v61, 1  ;;  %v621_v17 = vmul.f32 0.0625, %v54_v58  ;;  %v99_v43 = vadd.f32 %v98_v63, %v97_v57  ;;  %v151_v18 = vadd.f32 %v150_v0, %v149_v50 }
  0x36   :  { %v186_v31 = vrot.slane %v185_v42, 1  ;;  %v623_v44 = vmul.f32 0.0625, %v63_v4  ;;  %v108_v39 = vadd.f32 %v107_v26, %v106_v59  ;;  %v160_v38 = vadd.f32 %v159_v37, %v158_v60 }
  0x37   :  { %v195_v45 = vrot.slane %v194_v29, 1  ;;  %v625_v27 = vmul.f32 0.0625, %v72_v15  ;;  %v117_v47 = vadd.f32 %v116_v10, %v115_v62  ;;  %v169_v21 = vadd.f32 %v168_v28, %v167_v1 }
  0x38   :  { %v204_v51 = vrot.slane %v203_v30, 1  ;;  %v627_v33 = vmul.f32 0.0625, %v81_v20  ;;  %v178_v52 = vadd.f32 %v177_v19, %v176_v61  ;;  %v629_v34 = vmul.f32 0.0625, %v90_v11 }
  0x39   :  { %v214_v46 = vmul.f32 0.0625, %v142_v16  ;;  %v222_v49 = vmul.f32 %v621_v17, %v621_v17  ;;  %v187_v41 = vadd.f32 %v186_v31, %v185_v42  ;;  %v633_v57 = vmul.f32 0.0625, %v99_v43 }
  0x3a   :  { %v215_v50 = vmul.f32 0.0625, %v151_v18  ;;  %v223_v48 = vmul.f32 %v623_v44, %v623_v44  ;;  %v196_v54 = vadd.f32 %v195_v45, %v194_v29  ;;  %v637_v59 = vmul.f32 0.0625, %v108_v39 }
  0x3b   :  { %v216_v60 = vmul.f32 0.0625, %v160_v38  ;;  %v224_v55 = vmul.f32 %v625_v27, %v625_v27  ;;  %v205_v56 = vadd.f32 %v204_v51, %v203_v30  ;;  %v641_v62 = vmul.f32 0.0625, %v117_v47 }
  0x3c   :  { %v217_v1 = vmul.f32 0.0625, %v169_v21  ;;  %v225_v53 = vmul.f32 %v627_v33, %v627_v33  ;;  %v218_v58 = vmul.f32 0.0625, %v178_v52  ;;  %v226_v2 = vmul.f32 %v629_v34, %v629_v34 }
  0x3d   :  { %v230_v3 = vsub.f32 %v214_v46, %v222_v49  ;;  %v219_v61 = vmul.f32 0.0625, %v187_v41  ;;  %v227_v4 = vmul.f32 %v633_v57, %v633_v57  ;;  %v231_v63 = vsub.f32 %v215_v50, %v223_v48 }
  0x3e   :  { %v220_v0 = vmul.f32 0.0625, %v196_v54  ;;  %v228_v42 = vmul.f32 %v637_v59, %v637_v59  ;;  %v232_v15 = vsub.f32 %v216_v60, %v224_v55  ;;  %v221_v26 = vmul.f32 0.0625, %v205_v56 }
  0x3f   :  { %v229_v37 = vmul.f32 %v641_v62, %v641_v62  ;;  %v233_v29 = vsub.f32 %v217_v1, %v225_v53  ;;  %v234_v20 = vsub.f32 %v218_v58, %v226_v2  ;;  %v238_v10 = vmax.f32 %v230_v3, 0.0 }
  0x40   :  { %v235_v28 = vsub.f32 %v219_v61, %v227_v4  ;;  %v239_v30 = vmax.f32 %v231_v63, 0.0  ;;  %v236_v11 = vsub.f32 %v220_v0, %v228_v42  ;;  %v240_v16 = vmax.f32 %v232_v15, 0.0 }
  0x41   :  { %v237_v19 = vsub.f32 %v221_v26, %v229_v37  ;;  %v241_v43 = vmax.f32 %v233_v29, 0.0  ;;  %v242_v18 = vmax.f32 %v234_v20, 0.0  ;;  %v246_v31 = vadd.f32 1e-05, %v238_v10 }
  0x42   :  { %v243_v39 = vmax.f32 %v235_v28, 0.0  ;;  %v247_v38 = vadd.f32 1e-05, %v239_v30  ;;  %v244_v45 = vmax.f32 %v236_v11, 0.0  ;;  %v248_v47 = vadd.f32 1e-05, %v240_v16 }
  0x43   :  { %v245_v21 = vmax.f32 %v237_v19, 0.0  ;;  %v249_v51 = vadd.f32 1e-05, %v241_v43  ;;  %v250_v52 = vadd.f32 1e-05, %v242_v18  ;;  %390 = vrsqrt.f32 %v246_v31 }
  0x44   :  { %v251_v46 = vadd.f32 1e-05, %v243_v39  ;;  %392 = vrsqrt.f32 %v247_v38  ;;  %v252_v49 = vadd.f32 1e-05, %v244_v45  ;;  %v266_v1 = vsub.f32 %v493_v5, %v621_v17 }
  0x45   :  { %394 = vrsqrt.f32 %v248_v47  ;;  %v253_v41 = vadd.f32 1e-05, %v245_v21  ;;  %v268_v53 = vsub.f32 %v497_v7, %v623_v44  ;;  %v270_v58 = vsub.f32 %v501_v9, %v625_v27 }
  0x46   :  { %396 = vrsqrt.f32 %v249_v51  ;;  %v272_v2 = vsub.f32 %v509_v13, %v627_v33  ;;  %v274_v61 = vsub.f32 %v525_v22, %v629_v34  ;;  %v276_v4 = vsub.f32 %v529_v24, %v633_v57 }
  0x47   :  { %398 = vrsqrt.f32 %v250_v52  ;;  %v278_v63 = vsub.f32 %v543_v32, %v637_v59  ;;  %v280_v5 = vsub.f32 %v551_v36, %v641_v62  ;;  %v267_v9 = vsub.f32 %v495_v6, %v621_v17 }
  0x48   :  { %400 = vrsqrt.f32 %v251_v46  ;;  %v269_v13 = vsub.f32 %v499_v8, %v623_v44  ;;  %v271_v0 = vsub.f32 %v507_v12, %v625_v27  ;;  %v273_v22 = vsub.f32 %v511_v14, %v627_v33 }
  0x49   :  { %402 = vrsqrt.f32 %v252_v49  ;;  %v275_v24 = vsub.f32 %v527_v23, %v629_v34  ;;  %v277_v32 = vsub.f32 %v531_v25, %v633_v57  ;;  %v279_v36 = vsub.f32 %v549_v35, %v637_v59 }
  0x4a   :  { %404 = vrsqrt.f32 %v253_v41  ;;  %v281_v6 = vsub.f32 %v558_v40, %v641_v62 }
  0x50   :  { %v391_v50 = vpop.eup %390 }
  0x51   :  { %v393_v48 = vpop.eup %392  ;;  %v282_v17 = vmul.f32 %v391_v50, %v266_v1  ;;  %v283_v33 = vmul.f32 %v391_v50, %v267_v9 }
  0x52   :  { %v395_v54 = vpop.eup %394  ;;  %v284_v8 = vmul.f32 %v393_v48, %v268_v53  ;;  %v285_v26 = vmul.f32 %v393_v48, %v269_v13 }
  0x53   :  { %v397_v60 = vpop.eup %396  ;;  %v286_v44 = vmul.f32 %v395_v54, %v270_v58  ;;  %v287_v23 = vmul.f32 %v395_v54, %v271_v0 }
  0x54   :  { %v399_v55 = vpop.eup %398  ;;  %v288_v42 = vmul.f32 %v397_v60, %v272_v2  ;;  %v289_v34 = vmul.f32 %v397_v60, %v273_v22 }
  0x55   :  { %v401_v56 = vpop.eup %400  ;;  %v290_v12 = vmul.f32 %v399_v55, %v274_v61  ;;  %v291_v57 = vmul.f32 %v399_v55, %v275_v24 }
  0x56   :  { %v403_v3 = vpop.eup %402  ;;  %v292_v27 = vmul.f32 %v401_v56, %v276_v4  ;;  %v293_v29 = vmul.f32 %v401_v56, %v277_v32 }
  0x57   :  { %v405_v7 = vpop.eup %404  ;;  %v294_v15 = vmul.f32 %v403_v3, %v278_v63  ;;  %v295_v35 = vmul.f32 %v403_v3, %v279_v36 }
  0x58   :  { %v296_v14 = vmul.f32 %v405_v7, %v280_v5  ;;  %v297_v59 = vmul.f32 %v405_v7, %v281_v6 }
  0x8b   :  { %v327_v37 = vpop.permute.xlu1 %326  ;;  %v301_v25 = vpop.permute.xlu0 %300 }
  0x8c   :  { %v308_v20 = vmul.f32 %v301_v25, %v282_v17  ;;  %v310_v40 = vmul.f32 %v301_v25, %v284_v8  ;;  %v312_v62 = vmul.f32 %v301_v25, %v286_v44  ;;  %v314_v10 = vmul.f32 %v301_v25, %v288_v42 }
  0x8d   :  { %v316_v28 = vmul.f32 %v301_v25, %v290_v12  ;;  %v318_v30 = vmul.f32 %v301_v25, %v292_v27  ;;  %v320_v11 = vmul.f32 %v301_v25, %v294_v15  ;;  %v322_v16 = vmul.f32 %v301_v25, %v296_v14 }
  0x8e   :  { %v334_v19 = vadd.f32 %v327_v37, %v308_v20  ;;  %v336_v43 = vadd.f32 %v327_v37, %v310_v40  ;;  %v338_v18 = vadd.f32 %v327_v37, %v312_v62  ;;  %v340_v31 = vadd.f32 %v327_v37, %v314_v10 }
  0x8f   :  { %v342_v39 = vadd.f32 %v327_v37, %v316_v28  ;;  %v344_v38 = vadd.f32 %v327_v37, %v318_v30  ;;  %v346_v45 = vadd.f32 %v327_v37, %v320_v11  ;;  %v348_v47 = vadd.f32 %v327_v37, %v322_v16  ;;  %v306_v21 = vpop.permute.xlu0 %305  ;;  %v332_v41 = vpop.permute.xlu1 %331 }
  0x90   :  { %350 = vst.msk [vmem:[#allocation5] sm:$0xff] %vm45_vm0, %v334_v19  ;;  %352 = vst.msk [vmem:[#allocation5 + $0x10] sm:$0xff] %vm45_vm0, %v336_v43  ;;  %v309_v51 = vmul.f32 %v306_v21, %v283_v33  ;;  %v311_v52 = vmul.f32 %v306_v21, %v285_v26  ;;  %v313_v46 = vmul.f32 %v306_v21, %v287_v23 }
  0x91   :  { %354 = vst.msk [vmem:[#allocation5 + $0x20] sm:$0xff] %vm45_vm0, %v338_v18  ;;  %356 = vst.msk [vmem:[#allocation5 + $0x30] sm:$0xff] %vm45_vm0, %v340_v31  ;;  %v315_v49 = vmul.f32 %v306_v21, %v289_v34  ;;  %v317_v50 = vmul.f32 %v306_v21, %v291_v57  ;;  %v319_v48 = vmul.f32 %v306_v21, %v293_v29 }
  0x92   :  { %358 = vst.msk [vmem:[#allocation5 + $0x40] sm:$0xff] %vm45_vm0, %v342_v39  ;;  %360 = vst.msk [vmem:[#allocation5 + $0x50] sm:$0xff] %vm45_vm0, %v344_v38  ;;  %v321_v54 = vmul.f32 %v306_v21, %v295_v35  ;;  %v323_v60 = vmul.f32 %v306_v21, %v297_v59  ;;  %v335_v55 = vadd.f32 %v332_v41, %v309_v51 }
  0x93   :  { %362 = vst.msk [vmem:[#allocation5 + $0x60] sm:$0xff] %vm45_vm0, %v346_v45  ;;  %364 = vst.msk [vmem:[#allocation5 + $0x70] sm:$0xff] %vm45_vm0, %v348_v47  ;;  %v337_v56 = vadd.f32 %v332_v41, %v311_v52  ;;  %v339_v1 = vadd.f32 %v332_v41, %v313_v46  ;;  %v341_v53 = vadd.f32 %v332_v41, %v315_v49 }
  0x94   :  { %v343_v58 = vadd.f32 %v332_v41, %v317_v50  ;;  %v345_v2 = vadd.f32 %v332_v41, %v319_v48  ;;  %v347_v3 = vadd.f32 %v332_v41, %v321_v54  ;;  %v349_v61 = vadd.f32 %v332_v41, %v323_v60  ;;  %351 = vst.msk [vmem:[#allocation5 + $0x8] sm:$0xff] %vm45_vm0, %v335_v55 }
  0x95   :  { %353 = vst.msk [vmem:[#allocation5 + $0x18] sm:$0xff] %vm45_vm0, %v337_v56  ;;  %355 = vst.msk [vmem:[#allocation5 + $0x28] sm:$0xff] %vm45_vm0, %v339_v1 }
  0x96   :  { %357 = vst.msk [vmem:[#allocation5 + $0x38] sm:$0xff] %vm45_vm0, %v341_v53  ;;  %359 = vst.msk [vmem:[#allocation5 + $0x48] sm:$0xff] %vm45_vm0, %v343_v58 }
  0x97   :  { %361 = vst.msk [vmem:[#allocation5 + $0x58] sm:$0xff] %vm45_vm0, %v345_v2  ;;  %363 = vst.msk [vmem:[#allocation5 + $0x68] sm:$0xff] %vm45_vm0, %v347_v3 }
  0x98   :  { %365 = vst.msk [vmem:[#allocation5 + $0x78] sm:$0xff] %vm45_vm0, %v349_v61 }
  0x99   :  { %437 = shalt.err (!%p434_p9)
}
  0x9a   :  { %377 = dma.vmem_to_hbm [thread:$0]  %s372_s2, 2048, %s710_s3, [#allocation4], %s451_s15, %s451_s15, %s452_s16  }
  0x9b   :  { %448 = dma.done.wait [#allocation4], 2048  }
  0x9c   :  { %449 = vsyncadd [#allocation4], 4294965248 }
  0x9d   :  { %381 = vsyncpa [#allocation3], 1 }
  0x9e   :  { %382 = vsyncpa [#allocation4], 1 }

</bundles_post_ra>
